<compile_context>
chip_gen: v5e
topology: v5e:2x2
jax: 0.10.0
libtpu: 0.0.40
codegen_flags: <defaults>
</compile_context>

<pallas_src>
import functools

import jax
import jax.numpy as jnp
from jax.experimental import pallas as pl
from jax.experimental.pallas import tpu as pltpu


def _round_up(x, m):
    return (x + m - 1) // m * m


def _resblock_kernel(skip_mode, d_out, matmul_dtype, x_ref, *refs):
    """Fused ResBlock forward on one batch tile.

    skip_mode: "identity" | "separate" | "concat" (static python flag).
    Affine gains/biases are pre-folded into the linear weights on the host, so the
    kernel body is: matmul + bias + Supact, matmul + bias + Supact, + skip.
    """
    if skip_mode == "concat":
        wcat_ref, w2_ref, p_ref, o_ref = refs
    elif skip_mode == "separate":
        w1_ref, wskip_ref, w2_ref, p_ref, o_ref = refs
    else:  # identity
        w1_ref, w2_ref, p_ref, o_ref = refs

    x = x_ref[...]                       # (tb, Din) f32
    xm = x.astype(matmul_dtype)

    pv = p_ref[...]                      # (8, Dout) packed per-feature params
    b1, b2 = pv[0:1], pv[1:2]
    g1, be1 = pv[2:3], pv[3:4]
    g2, be2 = pv[4:5], pv[5:6]
    omg1, omg2 = pv[6:7], pv[7:8]        # 1 - gamma, precomputed on host

    # Stage 1 (skip matmul, if any, shares the same x LHS).
    if skip_mode == "concat":
        h = jnp.dot(xm, wcat_ref[...], preferred_element_type=jnp.float32)
        h1 = h[:, :d_out] + b1           # d_out is a multiple of 128 -> aligned split
        xskip = h[:, d_out:]
    elif skip_mode == "separate":
        h1 = jnp.dot(xm, w1_ref[...], preferred_element_type=jnp.float32) + b1
        xskip = jnp.dot(xm, wskip_ref[...], preferred_element_type=jnp.float32)
    else:
        h1 = jnp.dot(xm, w1_ref[...], preferred_element_type=jnp.float32) + b1
        xskip = x                        # Identity skip (Din == Dout), f32 residual

    # Supact1: (gamma + sigmoid(beta*h)*(1-gamma)) * h
    o1 = (g1 + jax.nn.sigmoid(be1 * h1) * omg1) * h1

    # Stage 2 (Affine2 pre-folded) + Supact2 + residual add.
    h2 = jnp.dot(o1.astype(matmul_dtype), w2_ref[...],
                 preferred_element_type=jnp.float32) + b2
    o2 = (g2 + jax.nn.sigmoid(be2 * h2) * omg2) * h2 + xskip
    o_ref[...] = o2.astype(o_ref.dtype)


def _vmem_budget_bytes():
    """~85% of this generation's physical VMEM (128 MiB v5e/v6e, 64 MiB v7x)."""
    try:
        cap = int(pltpu.get_tpu_info().vmem_capacity_bytes)
    except Exception:
        cap = 64 * 2 ** 20  # conservative (v7x-sized) fallback
    return max(32 * 2 ** 20, int(0.85 * cap))


def resblock_forward(x, params, *, tb=None, matmul_dtype=jnp.bfloat16):
    """x: (B, Din) f32. params: dict of f32 arrays (see init_resblock_params)."""
    B, Din = x.shape
    Dout = params["w1_t"].shape[1]
    use_skip_linear = "wskip_t" in params   # PyTorch: Linear skip iff in_size != out_size
    if not use_skip_linear:
        assert Din == Dout, "Identity skip requires in_size == out_size"

    # ---- fold scalar Affine into Linear weights/biases (host side, exact algebra) ----
    g1, a1 = params["gain1"][0], params["abias1"][0]
    g2, a2 = params["gain2"][0], params["abias2"][0]
    w1f = (params["w1_t"] * g1).astype(matmul_dtype)
    b1f = params["b1"] + a1 * jnp.sum(params["w1_t"], axis=0, keepdims=True)
    w2f = (params["w2_t"] * g2).astype(matmul_dtype)
    b2f = params["b2"] + a2 * jnp.sum(params["w2_t"], axis=0, keepdims=True)

    # Per-feature params packed into one (8, Dout) operand (rows: b1, b2, g1, be1, g2,
    # be2, 1-g1, 1-g2) -> one DMA instead of six sublane-padded (1, Dout) buffers.
    pvec = jnp.concatenate(
        [b1f, b2f, params["gamma1"], params["beta1"], params["gamma2"],
         params["beta2"], 1.0 - params["gamma1"], 1.0 - params["gamma2"]],
        axis=0).astype(jnp.float32)

    if not use_skip_linear:
        skip_mode = "identity"
        weight_ops = (w1f, w2f)
        weight_shapes = ((Din, Dout), (Dout, Dout))
    elif Dout % 128 == 0:
        skip_mode = "concat"     # one MXU matmul; split lands on a 128-lane boundary
        wcat = jnp.concatenate(
            [w1f, params["wskip_t"].astype(matmul_dtype)], axis=1)
        weight_ops = (wcat, w2f)
        weight_shapes = ((Din, 2 * Dout), (Dout, Dout))
    else:
        skip_mode = "separate"   # two matmuls share the x LHS; avoids unaligned slice
        wskip = params["wskip_t"].astype(matmul_dtype)
        weight_ops = (w1f, wskip, w2f)
        weight_shapes = ((Din, Dout), (Din, Dout), (Dout, Dout))

    # ---- batch tile selection (no host-side batch padding; ragged last block OK) ----
    tb = 2048 if tb is None else tb
    if B <= 512 and B <= tb:
        tb_eff, grid = B, (1,)          # single block == full array dims (always legal)
    else:
        # 256-aligned (v6e/v7x 256-wide MXU); aim for >=2 steps so the "parallel" grid
        # axis can shard across v7x's two TensorCores.
        tb_eff = min(tb, _round_up(pl.cdiv(B, 2), 256))
        tb_eff = max(256, _round_up(tb_eff, 256))
        grid = (pl.cdiv(B, tb_eff),)

    # ---- BlockSpecs: x/out batch-tiled; weights & packed params grid-invariant ----
    def invariant(shape):
        return pl.BlockSpec(shape, lambda i: (0, 0))

    in_specs = [pl.BlockSpec((tb_eff, Din), lambda i: (i, 0))]
    in_specs += [invariant(s) for s in weight_shapes]
    in_specs += [invariant((8, Dout))]
    out_spec = pl.BlockSpec((tb_eff, Dout), lambda i: (i, 0))
    operands = (x, *weight_ops, pvec)

    # ---- VMEM budget: 2x (double-buffered) input blocks + output block + headroom ----
    w_bytes = sum(int(w.size) * w.dtype.itemsize for w in weight_ops)
    block_in = tb_eff * Din * 4 + w_bytes + 8 * Dout * 4
    block_out = tb_eff * Dout * 4
    need = 2 * (block_in + block_out) + (4 << 20)
    vmem_limit = int(min(_vmem_budget_bytes(), max(32 << 20, need)))

    flops = (2 * B * Din * Dout * (2 if use_skip_linear else 1)
             + 2 * B * Dout * Dout + 12 * B * Dout)
    transcendentals = 2 * B * Dout
    bytes_accessed = (sum(int(o.size) * o.dtype.itemsize for o in operands)
                      + B * Dout * 4)

    kernel = functools.partial(_resblock_kernel, skip_mode, Dout, matmul_dtype)
    out = pl.pallas_call(
        kernel,
        out_shape=jax.ShapeDtypeStruct((B, Dout), jnp.float32),
        grid=grid,
        in_specs=in_specs,
        out_specs=out_spec,
        compiler_params=pltpu.CompilerParams(
            dimension_semantics=("parallel",),
            vmem_limit_bytes=vmem_limit),
        cost_estimate=pl.CostEstimate(flops=int(flops),
                                      transcendentals=int(transcendentals),
                                      bytes_accessed=int(bytes_accessed)),
    )(*operands)
    return out.astype(x.dtype)


def init_resblock_params(key, in_size, out_size):
    """Deterministic synthetic parameter init (shapes match the PyTorch module)."""
    ks = jax.random.split(key, 10)
    p = {}
    # nn.Linear weights are (out, in) in PyTorch; store pre-transposed (in, out).
    p["w1_t"] = jax.random.normal(ks[0], (in_size, out_size), jnp.float32) / jnp.sqrt(in_size)
    p["b1"] = jax.random.normal(ks[1], (1, out_size), jnp.float32) * 0.1
    p["w2_t"] = jax.random.normal(ks[2], (out_size, out_size), jnp.float32) / jnp.sqrt(out_size)
    p["b2"] = jax.random.normal(ks[3], (1, out_size), jnp.float32) * 0.1
    if in_size != out_size:
        p["wskip_t"] = jax.random.normal(ks[4], (in_size, out_size), jnp.float32) / jnp.sqrt(in_size)
    # Affine: gain=1, bias=0 in __init__; perturb deterministically to exercise the math.
    p["gain1"] = 1.0 + 0.1 * jax.random.normal(ks[5], (1,), jnp.float32)
    p["abias1"] = 0.1 * jax.random.normal(ks[6], (1,), jnp.float32)
    p["gain2"] = 1.0 + 0.1 * jax.random.normal(ks[7], (1,), jnp.float32)
    p["abias2"] = 0.1 * jax.random.normal(ks[8], (1,), jnp.float32)
    # Supact params act on out_size features (== in_size in the PyTorch-valid case).
    kk = jax.random.split(ks[9], 4)
    p["gamma1"] = 1.0 + 0.1 * jax.random.normal(kk[0], (1, out_size), jnp.float32)
    p["beta1"] = 0.5 * jax.random.normal(kk[1], (1, out_size), jnp.float32)
    p["gamma2"] = 1.0 + 0.1 * jax.random.normal(kk[2], (1, out_size), jnp.float32)
    p["beta2"] = 0.5 * jax.random.normal(kk[3], (1, out_size), jnp.float32)
    return p


def resblock_reference(x, params):
    """Pure-JAX f32 reference mirroring the PyTorch forward (full-precision matmuls)."""
    hp = jax.lax.Precision.HIGHEST

    def mm(a, b):
        return jnp.dot(a, b, precision=hp)

    xskip = mm(x, params["wskip_t"]) if "wskip_t" in params else x

    def supact(h, gamma, beta):
        return (gamma + jax.nn.sigmoid(beta * h) * (1.0 - gamma)) * h

    h1 = x * params["gain1"][0] + params["abias1"][0]
    h1 = mm(h1, params["w1_t"]) + params["b1"]
    o1 = supact(h1, params["gamma1"], params["beta1"])
    h2 = o1 * params["gain2"][0] + params["abias2"][0]
    h2 = mm(h2, params["w2_t"]) + params["b2"]
    return supact(h2, params["gamma2"], params["beta2"]) + xskip


if __name__ == "__main__":
    def check(name, b, in_size, out_size, tb=None):
        key = jax.random.PRNGKey(0)
        kx, kp = jax.random.split(key)
        x = jax.random.normal(kx, (b, in_size), jnp.float32)
        params = init_resblock_params(kp, in_size, out_size)
        ref = resblock_reference(x, params)

        # Strict check on the f32-matmul path (validates kernel algebra / fused skip).
        out32 = jax.block_until_ready(
            resblock_forward(x, params, tb=tb, matmul_dtype=jnp.float32))
        assert out32.shape == (b, out_size), (name, out32.shape)
        err32 = float(jnp.max(jnp.abs(out32 - ref)))
        assert jnp.allclose(out32, ref, rtol=1e-3, atol=1e-3), (name, "f32 mismatch", err32)

        # Default bf16-matmul fast path (MXU-native), bf16-appropriate tolerance.
        outbf = jax.block_until_ready(
            resblock_forward(x, params, tb=tb, matmul_dtype=jnp.bfloat16))
        assert outbf.shape == (b, out_size), (name, outbf.shape)
        errbf = float(jnp.max(jnp.abs(outbf - ref)))
        assert jnp.allclose(outbf, ref, rtol=8e-2, atol=8e-2), (name, "bf16 mismatch", errbf)

    # Identity-skip case (the only shape combo the original PyTorch module supports).
    check("identity_skip", b=8, in_size=32, out_size=32)
    # Linear-skip, Dout not 128-aligned: exercises the two-matmul (separate) skip path
    # with unpadded small feature dims.
    check("linear_skip_small", b=16, in_size=48, out_size=32)
    # Linear-skip, Dout 128-aligned: exercises the concatenated [w1|wskip] matmul path,
    # a multi-step "parallel" grid and a ragged final batch block (no host padding).
    check("linear_skip_concat_ragged_grid", b=272, in_size=64, out_size=128, tb=256)

    print("KERNEL_OK")
</pallas_src>

<mosaic_0001>
module attributes {stable_mosaic.version = 11 : i64} {
  func.func @_resblock_kernel(%arg0: i32, %arg1: memref<8x32xf32, #tpu.memory_space<vmem>>, %arg2: memref<32x32xf32, #tpu.memory_space<vmem>>, %arg3: memref<32x32xf32, #tpu.memory_space<vmem>>, %arg4: memref<8x32xf32, #tpu.memory_space<vmem>>, %arg5: memref<8x32xf32, #tpu.memory_space<vmem>>) attributes {dimension_semantics = [#tpu.dimension_semantics<parallel>], iteration_bounds = array<i64: 1>, scalar_prefetch = 0 : i64, scratch_operands = 0 : i64, tpu.core_type = #tpu.core_type<tc>, window_params = [{transform_indices = @transform_0, window_bounds = array<i64: 8, 32>}, {pipeline_mode = #tpu.pipeline_mode<synchronous>, transform_indices = @transform_1, window_bounds = array<i64: 32, 32>}, {pipeline_mode = #tpu.pipeline_mode<synchronous>, transform_indices = @transform_2, window_bounds = array<i64: 32, 32>}, {pipeline_mode = #tpu.pipeline_mode<synchronous>, transform_indices = @transform_3, window_bounds = array<i64: 8, 32>}, {transform_indices = @transform_4, window_bounds = array<i64: 8, 32>}]} {
    %c0 = arith.constant 0 : index
    %c0_0 = arith.constant 0 : index
    %0 = vector.load %arg1[%c0, %c0_0] : memref<8x32xf32, #tpu.memory_space<vmem>>, vector<8x32xf32>
    %c0_1 = arith.constant 0 : index
    %c0_2 = arith.constant 0 : index
    %1 = vector.load %arg4[%c0_1, %c0_2] : memref<8x32xf32, #tpu.memory_space<vmem>>, vector<8x32xf32>
    %2 = vector.extract_strided_slice %1 {offsets = [0, 0], sizes = [1, 32], strides = [1, 1]} : vector<8x32xf32> to vector<1x32xf32>
    %3 = vector.extract_strided_slice %1 {offsets = [1, 0], sizes = [1, 32], strides = [1, 1]} : vector<8x32xf32> to vector<1x32xf32>
    %4 = vector.extract_strided_slice %1 {offsets = [2, 0], sizes = [1, 32], strides = [1, 1]} : vector<8x32xf32> to vector<1x32xf32>
    %5 = vector.extract_strided_slice %1 {offsets = [3, 0], sizes = [1, 32], strides = [1, 1]} : vector<8x32xf32> to vector<1x32xf32>
    %6 = vector.extract_strided_slice %1 {offsets = [4, 0], sizes = [1, 32], strides = [1, 1]} : vector<8x32xf32> to vector<1x32xf32>
    %7 = vector.extract_strided_slice %1 {offsets = [5, 0], sizes = [1, 32], strides = [1, 1]} : vector<8x32xf32> to vector<1x32xf32>
    %8 = vector.extract_strided_slice %1 {offsets = [6, 0], sizes = [1, 32], strides = [1, 1]} : vector<8x32xf32> to vector<1x32xf32>
    %9 = vector.extract_strided_slice %1 {offsets = [7, 0], sizes = [1, 32], strides = [1, 1]} : vector<8x32xf32> to vector<1x32xf32>
    %c0_3 = arith.constant 0 : index
    %c0_4 = arith.constant 0 : index
    %10 = vector.load %arg2[%c0_3, %c0_4] : memref<32x32xf32, #tpu.memory_space<vmem>>, vector<32x32xf32>
    %cst = arith.constant dense<0.000000e+00> : vector<8x32xf32>
    %11 = tpu.matmul %0, %10, %cst {dimension_numbers = #tpu.dot_dimension_numbers<[1], [0], [0], [1], [0, 0, 1, 1], [], []>} : vector<8x32xf32>, vector<32x32xf32>, vector<8x32xf32> -> vector<8x32xf32>
    %12 = vector.broadcast %2 : vector<1x32xf32> to vector<8x32xf32>
    %13 = arith.addf %11, %12 : vector<8x32xf32>
    %14 = vector.broadcast %5 : vector<1x32xf32> to vector<8x32xf32>
    %15 = arith.mulf %14, %13 : vector<8x32xf32>
    %16 = arith.negf %15 : vector<8x32xf32>
    %17 = math.exp %16 : vector<8x32xf32>
    %cst_5 = arith.constant 1.000000e+00 : f32
    %18 = vector.broadcast %cst_5 : f32 to vector<8x32xf32>
    %19 = arith.addf %18, %17 : vector<8x32xf32>
    %20 = arith.divf %18, %19 : vector<8x32xf32>
    %21 = vector.broadcast %8 : vector<1x32xf32> to vector<8x32xf32>
    %22 = arith.mulf %20, %21 : vector<8x32xf32>
    %23 = vector.broadcast %4 : vector<1x32xf32> to vector<8x32xf32>
    %24 = arith.addf %23, %22 : vector<8x32xf32>
    %25 = arith.mulf %24, %13 : vector<8x32xf32>
    %c0_6 = arith.constant 0 : index
    %c0_7 = arith.constant 0 : index
    %26 = vector.load %arg3[%c0_6, %c0_7] : memref<32x32xf32, #tpu.memory_space<vmem>>, vector<32x32xf32>
    %cst_8 = arith.constant dense<0.000000e+00> : vector<8x32xf32>
    %27 = tpu.matmul %25, %26, %cst_8 {dimension_numbers = #tpu.dot_dimension_numbers<[1], [0], [0], [1], [0, 0, 1, 1], [], []>} : vector<8x32xf32>, vector<32x32xf32>, vector<8x32xf32> -> vector<8x32xf32>
    %28 = vector.broadcast %3 : vector<1x32xf32> to vector<8x32xf32>
    %29 = arith.addf %27, %28 : vector<8x32xf32>
    %30 = vector.broadcast %7 : vector<1x32xf32> to vector<8x32xf32>
    %31 = arith.mulf %30, %29 : vector<8x32xf32>
    %32 = arith.negf %31 : vector<8x32xf32>
    %33 = math.exp %32 : vector<8x32xf32>
    %cst_9 = arith.constant 1.000000e+00 : f32
    %34 = vector.broadcast %cst_9 : f32 to vector<8x32xf32>
    %35 = arith.addf %34, %33 : vector<8x32xf32>
    %36 = arith.divf %34, %35 : vector<8x32xf32>
    %37 = vector.broadcast %9 : vector<1x32xf32> to vector<8x32xf32>
    %38 = arith.mulf %36, %37 : vector<8x32xf32>
    %39 = vector.broadcast %6 : vector<1x32xf32> to vector<8x32xf32>
    %40 = arith.addf %39, %38 : vector<8x32xf32>
    %41 = arith.mulf %40, %29 : vector<8x32xf32>
    %42 = arith.addf %41, %0 : vector<8x32xf32>
    %c0_10 = arith.constant 0 : index
    %c0_11 = arith.constant 0 : index
    %43 = vector.load %arg5[%c0_10, %c0_11] : memref<8x32xf32, #tpu.memory_space<vmem>>, vector<8x32xf32>
    tpu.vector_store %arg5[%c0_10, %c0_11], %42 {strides = array<i32>} : memref<8x32xf32, #tpu.memory_space<vmem>>, vector<8x32xf32>,
    return
  }
  func.func @transform_0(%arg0: i32) -> (i32, i32) {
    %c0_i32 = arith.constant 0 : i32
    %c0_i32_0 = arith.constant 0 : i32
    return %arg0, %c0_i32 : i32, i32
  }
  func.func @transform_1(%arg0: i32) -> (i32, i32) {
    %c0_i32 = arith.constant 0 : i32
    %c0_i32_0 = arith.constant 0 : i32
    %c0_i32_1 = arith.constant 0 : i32
    return %c0_i32, %c0_i32_0 : i32, i32
  }
  func.func @transform_2(%arg0: i32) -> (i32, i32) {
    %c0_i32 = arith.constant 0 : i32
    %c0_i32_0 = arith.constant 0 : i32
    %c0_i32_1 = arith.constant 0 : i32
    return %c0_i32, %c0_i32_0 : i32, i32
  }
  func.func @transform_3(%arg0: i32) -> (i32, i32) {
    %c0_i32 = arith.constant 0 : i32
    %c0_i32_0 = arith.constant 0 : i32
    %c0_i32_1 = arith.constant 0 : i32
    return %c0_i32, %c0_i32_0 : i32, i32
  }
  func.func @transform_4(%arg0: i32) -> (i32, i32) {
    %c0_i32 = arith.constant 0 : i32
    %c0_i32_0 = arith.constant 0 : i32
    return %arg0, %c0_i32 : i32, i32
  }
}

</mosaic_0001>

<bundles_post_ra>
// kernel: tpu_custom_call.1
= control target key start
LH: loop header
LB: loop body
LE: loop exit
PB: predicated region body
PF: predicated region fallthrough
CT: control target
= control target key end

     0   :  { %9 = vsyncpa [#allocation3], 0  ;;  %s420_s0 = inlined_call_operand.hbm [shape: f32[8,32], index: 0, kind: input, shape index: {}]   ;;  %s421_s1 = inlined_call_operand.hbm [shape: f32[32,32], index: 1, kind: input, shape index: {}]   ;;  %s422_s2 = inlined_call_operand.hbm [shape: f32[32,32], index: 2, kind: input, shape index: {}]   ;;  %s423_s3 = inlined_call_operand.hbm [shape: f32[8,32], index: 3, kind: input, shape index: {}]   ;;  %s424_s4 = inlined_call_operand.hbm [shape: f32[8,32], index: 4, kind: output, shape index: {}]  }
   0x1   :  { %10 = vsyncpa [#allocation6], 0 }
   0x2   :  { %11 = vsyncpa [#allocation9], 0  ;;  %s28_s17 = sshll.u32 %s421_s1, 4  ;;  %s29_s17 = int_to_ptr.hbm [resolvable:$true] %s28_s17 }
   0x3   :  { %12 = vsyncpa [#allocation4], 0  ;;  %s356_s18 = smov [#allocation5]   ;;  %s18_s22 = sshll.u32 %s420_s0, 4  ;;  %s19_s22 = int_to_ptr.hbm [resolvable:$true] %s18_s22 }
   0x4   :  { %s30_s19 = sshll.u32 %s356_s18, 4  ;;  %s357_s23 = smov 128   ;;  %s31_s19 = int_to_ptr.vmem [resolvable:$true] %s30_s19 }
   0x5   :  { %s358_s24 = smov 8   ;;  %s359_s25 = smov [#allocation2]  }
   0x6   :  { %36 = dma.hbm_to_vmem [thread:$0]  %s29_s17, 512, %s31_s19, [#allocation6], %s357_s23, %s357_s23, %s358_s24  }
   0x7   :  { %s20_s26 = sshll.u32 %s359_s25, 4  ;;  %s41_s29 = sshll.u32 %s422_s2, 4  ;;  %s21_s26 = int_to_ptr.vmem [resolvable:$true] %s20_s26  ;;  %s42_s29 = int_to_ptr.hbm [resolvable:$true] %s41_s29 }
   0x8   :  { %23 = dma.hbm_to_vmem [thread:$0]  %s19_s22, 128, %s21_s26, [#allocation3]  }
   0x9   :  { %s55_s5 = sshll.u32 %s423_s3, 4  ;;  %s360_s6 = smov [#allocation7]   ;;  %s56_s5 = int_to_ptr.hbm [resolvable:$true] %s55_s5 }
   0xa   :  { %s43_s7 = sshll.u32 %s360_s6, 4  ;;  %s361_s0 = smov [#allocation8]   ;;  %s44_s7 = int_to_ptr.vmem [resolvable:$true] %s43_s7 }
   0xb   :  { %49 = dma.hbm_to_vmem [thread:$0]  %s42_s29, 512, %s44_s7, [#allocation6], %s357_s23, %s357_s23, %s358_s24  }
   0xc   :  { %s57_s8 = sshll.u32 %s361_s0, 4  ;;  %s58_s8 = int_to_ptr.vmem [resolvable:$true] %s57_s8 }
   0xd   :  { %60 = dma.hbm_to_vmem [thread:$0]  %s56_s5, 128, %s58_s8, [#allocation9]  }
   0xe   :  { %348 = dma.done.wait [#allocation3], 128  }
   0xf   :  { %349 = vsyncadd [#allocation3], 4294967168 }
  0x10   :  { %350 = dma.done.wait [#allocation6], 1024  }
  0x11   :  { %351 = vsyncadd [#allocation6], 4294966272 }
  0x12   :  { %352 = dma.done.wait [#allocation9], 128  }
  0x13   :  { %353 = vsyncadd [#allocation9], 4294967168  ;;  %v82_v0 = vld [vmem:[#allocation5 + $0x18] sm:$0xff]  ;;  %v81_v1 = vld [vmem:[#allocation5 + $0x10] sm:$0xff]  ;;  %vm84_vm0 = vcmask 261120   ;;  %s362_s2 = smov [#allocation10]  }
  0x14   :  { %100 = vmatpush.msra.mxu0 %v82_v0  ;;  %v80_v2 = vld [vmem:[#allocation5 + $0x8] sm:$0xff]  ;;  %v79_v3 = vld [vmem:[#allocation5] sm:$0xff]  ;;  %v400_v4 = vld [vmem:[#allocation2] sm:$0xff]  ;;  %s195_s3 = sshll.u32 %s362_s2, 4  ;;  %s197_s11 = sshll.u32 %s424_s4, 4  ;;  %s196_s3 = int_to_ptr.vmem [resolvable:$true] %s195_s3  ;;  %s198_s11 = int_to_ptr.hbm [resolvable:$true] %s197_s11 }
  0x15   :  { %v404_v5 = vld [vmem:[#allocation8] sm:$0xff]  ;;  %v137_v8 = vld [vmem:[#allocation7 + $0x18] sm:$0xff]  ;;  %v136_v11 = vld [vmem:[#allocation7 + $0x10] sm:$0xff] }
  0x16   :  { %101 = vmatpush.msra.mxu0 %v81_v1  ;;  %v83_v6 = vperm.slane %v404_v5, 0  ;;  %v108_v7 = vperm.slane %v404_v5, 3  ;;  %154 = vmatpush.msra.mxu1 %v137_v8  ;;  %v135_v13 = vld [vmem:[#allocation7 + $0x8] sm:$0xff]  ;;  %v134_v15 = vld [vmem:[#allocation7] sm:$0xff]  ;;  %v129_v25 = vperm.slane %v404_v5, 6  ;;  %v131_v28 = vperm.slane %v404_v5, 2 }
  0x17   :  { %v138_v33 = vperm.slane %v404_v5, 1  ;;  %v162_v34 = vperm.slane %v404_v5, 5  ;;  %v183_v48 = vperm.slane %v404_v5, 7  ;;  %v185_v51 = vperm.slane %v404_v5, 4 }
  0x18   :  { %102 = vmatpush.msra.mxu0 %v80_v2  ;;  %155 = vmatpush.msra.mxu1 %v136_v11 }
  0x1a   :  { %103 = vmatpush.msra.mxu0 %v79_v3  ;;  %156 = vmatpush.msra.mxu1 %v135_v13 }
  0x1b   :  { %209 = vmatmul.msk.f32.vlgmr.msra.gmra.mxu0 %vm84_vm0, %v400_v4 }
  0x1c   :  { %157 = vmatpush.msra.mxu1 %v134_v15 }
  0x98   :  { %v105_v9 = vpop.f32.mrf.mxu0 }
  0x99   :  { %v106_v10 = vadd.f32 %v105_v9, %v83_v6 }
  0x9b   :  { %v109_v12 = vmul.f32 %v108_v7, %v106_v10 }
  0x9d   :  { %v210_v14 = vmul.f32 -1.442695, %v109_v12 }
  0x9f   :  { %220 = vpow2.f32 %v210_v14 }
  0xa5   :  { %v221_v16 = vpop.eup %220 }
  0xa6   :  { %v113_v17 = vadd.f32 1.0, %v221_v16 }
  0xa8   :  { %222 = vrcp.f32 %v113_v17  ;;  %v125_v21 = vand.u32 2147483648, %v113_v17  ;;  %v123_v23 = vand.u32 2147483647, %v113_v17  ;;  %vm119_vm2 = vweird.f32 %v113_v17 }
  0xaa   :  { %v126_v26 = vor.u32 1.1754944e-38, %v125_v21  ;;  %vm124_vm4 = vcmp.eq.f32.partialorder %v123_v23, 8.507059e+37 }
  0xae   :  { %v223_v18 = vpop.eup %222 }
  0xaf   :  { %v115_v19 = vmul.f32 %v223_v18, %v113_v17  ;;  %vm120_vm1 = vweird.f32 %v223_v18 }
  0xb0   :  { %vm121_vm3 = vmor %vm119_vm2, %vm120_vm1 }
  0xb1   :  { %v116_v20 = vsub.f32 1.0, %v115_v19 }
  0xb3   :  { %v117_v22 = vmul.f32 %v223_v18, %v116_v20 }
  0xb5   :  { %v118_v24 = vadd.f32 %v223_v18, %v117_v22 }
  0xb7   :  { %v122_v27 = vsel %vm121_vm3, %v223_v18, %v118_v24 }
  0xb8   :  { %v127_v29 = vsel %vm124_vm4, %v126_v26, %v122_v27 }
  0xb9   :  { %v130_v30 = vmul.f32 %v129_v25, %v127_v29 }
  0xbb   :  { %v132_v31 = vadd.f32 %v131_v28, %v130_v30 }
  0xbd   :  { %v133_v32 = vmul.f32 %v132_v31, %v106_v10 }
  0xbf   :  { %211 = vmatmul.msk.f32.vlgmr.msra.gmra.mxu1 %vm84_vm0, %v133_v32 }
 0x13c   :  { %v159_v35 = vpop.f32.mrf.mxu1 }
 0x13d   :  { %v160_v36 = vadd.f32 %v159_v35, %v138_v33 }
 0x13f   :  { %v163_v37 = vmul.f32 %v162_v34, %v160_v36 }
 0x141   :  { %v212_v38 = vmul.f32 -1.442695, %v163_v37 }
 0x143   :  { %224 = vpow2.f32 %v212_v38 }
 0x149   :  { %v225_v39 = vpop.eup %224 }
 0x14a   :  { %v167_v40 = vadd.f32 1.0, %v225_v39 }
 0x14c   :  { %226 = vrcp.f32 %v167_v40  ;;  %v179_v44 = vand.u32 2147483648, %v167_v40  ;;  %v177_v46 = vand.u32 2147483647, %v167_v40  ;;  %vm173_vm6 = vweird.f32 %v167_v40 }
 0x14e   :  { %v180_v49 = vor.u32 1.1754944e-38, %v179_v44  ;;  %vm178_vm8 = vcmp.eq.f32.partialorder %v177_v46, 8.507059e+37 }
 0x152   :  { %v227_v41 = vpop.eup %226 }
 0x153   :  { %v169_v42 = vmul.f32 %v227_v41, %v167_v40  ;;  %vm174_vm5 = vweird.f32 %v227_v41 }
 0x154   :  { %vm175_vm7 = vmor %vm173_vm6, %vm174_vm5 }
 0x155   :  { %v170_v43 = vsub.f32 1.0, %v169_v42 }
 0x157   :  { %v171_v45 = vmul.f32 %v227_v41, %v170_v43 }
 0x159   :  { %v172_v47 = vadd.f32 %v227_v41, %v171_v45 }
 0x15b   :  { %v176_v50 = vsel %vm175_vm7, %v227_v41, %v172_v47 }
 0x15c   :  { %v181_v52 = vsel %vm178_vm8, %v180_v49, %v176_v50 }
 0x15d   :  { %v184_v53 = vmul.f32 %v183_v48, %v181_v52 }
 0x15f   :  { %v186_v54 = vadd.f32 %v185_v51, %v184_v53 }
 0x161   :  { %v187_v55 = vmul.f32 %v186_v54, %v160_v36 }
 0x163   :  { %v188_v56 = vadd.f32 %v187_v55, %v400_v4 }
 0x165   :  { %189 = vst.msk [vmem:[#allocation10] sm:$0xff] %vm84_vm0, %v188_v56 }
 0x166   :  { %200 = dma.vmem_to_hbm [thread:$0]  %s196_s3, 128, %s198_s11, [#allocation4]  }
 0x167   :  { %354 = dma.done.wait [#allocation4], 128  }
 0x168   :  { %355 = vsyncadd [#allocation4], 4294967168 }
 0x169   :  { %205 = vsyncpa [#allocation3], 1 }
 0x16a   :  { %206 = vsyncpa [#allocation6], 1 }
 0x16b   :  { %207 = vsyncpa [#allocation9], 1 }
 0x16c   :  { %208 = vsyncpa [#allocation4], 1 }

</bundles_post_ra>
